<compile_context>
chip_gen: v5e
topology: v5e:2x2
jax: 0.10.0
libtpu: 0.0.40
codegen_flags: <defaults>
</compile_context>

<pallas_src>
import functools

import jax
import jax.numpy as jnp
from jax.experimental import pallas as pl
from jax.experimental.pallas import tpu as pltpu

_LANE = 128
_SUBLANE = 8
# v7x has 64 MiB physical VMEM per TensorCore (v5e/v6e: 128 MiB).  Budget the
# double-buffered working set so one tiling decision is safe on every chip.
_VMEM_BUDGET = 40 * 1024 * 1024
_VMEM_CAP = 48 * 1024 * 1024


def _round_up(x, m):
    return ((x + m - 1) // m) * m


def _vmem_limit(buffer_bytes):
    # Size the scoped-VMEM limit from the real working set (+25% for Mosaic
    # internals), floor 16 MiB (v5e default scoped limit), cap for v7x safety.
    return int(min(max(int(buffer_bytes * 1.25) + (1 << 20), 16 << 20), _VMEM_CAP))


def _leaky_relu(y, negative_slope):
    return jnp.where(y >= 0, y, negative_slope * y)


# --------------------------------------------------------------------------- #
# Kernels
# --------------------------------------------------------------------------- #
def _resident_kernel(x_ref, w_ref, b_ref, o_ref, *, negative_slope):
    # x_ref: (tm, K)  w_ref: (K, tn)  b_ref: (1, tn)  o_ref: (tm, tn)
    # Single MXU call over the full (padded) Cin, bias + LeakyReLU fused epilogue.
    y = jnp.dot(x_ref[...], w_ref[...], preferred_element_type=jnp.float32)
    y = y + b_ref[...].astype(jnp.float32)
    o_ref[...] = _leaky_relu(y, negative_slope).astype(o_ref.dtype)


def _tiled_kernel(x_ref, w_ref, b_ref, o_ref, acc_ref, *, negative_slope):
    # x_ref: (tm, tk)  w_ref: (tk, tn)  b_ref: (1, tn)  o_ref: (tm, tn)
    # acc_ref: (tm, tn) f32 scratch; K is the last (arbitrary) grid axis.
    k = pl.program_id(2)

    @pl.when(k == 0)
    def _init():
        # Fold the bias into the accumulator init: no per-K-step VPU add.
        acc_ref[...] = jnp.broadcast_to(
            b_ref[...].astype(jnp.float32), acc_ref.shape
        )

    acc_ref[...] += jnp.dot(
        x_ref[...], w_ref[...], preferred_element_type=jnp.float32
    )

    @pl.when(k == pl.num_programs(2) - 1)
    def _finalize():
        o_ref[...] = _leaky_relu(acc_ref[...], negative_slope).astype(o_ref.dtype)


# --------------------------------------------------------------------------- #
# Wrapper
# --------------------------------------------------------------------------- #
def prepare_params(weight, bias, mxu_dtype=jnp.bfloat16):
    """One-time conversion of PyTorch-layout nn.Linear params.

    Returns the weight transposed to (Cin, Cout) and cast to the MXU dtype so
    the per-call wrapper does no transpose / cast HBM passes, plus the bias in
    f32.  Use with discriminator_block(..., weight_layout="io").
    """
    w_io = jnp.asarray(weight).T
    if mxu_dtype is not None:
        w_io = w_io.astype(mxu_dtype)
    return w_io, jnp.asarray(bias).astype(jnp.float32)


def discriminator_block(
    x,
    weight,
    bias,
    negative_slope,
    *,
    weight_layout="oi",     # "oi": PyTorch (Cout, Cin); "io": pre-transposed (Cin, Cout)
    mxu_dtype=jnp.bfloat16, # None => keep f32 matmul inputs (exact, ~3x slower MXU)
    path=None,              # None auto; "resident" / "tiled" to force a path
    interpret=False,
):
    """LeakyReLU(x @ W^T + b).  x: (B, Cin)."""
    assert weight_layout in ("oi", "io")
    x = jnp.asarray(x)
    w_io = jnp.asarray(weight)
    if weight_layout == "oi":
        w_io = w_io.T
    B, Cin = x.shape
    Cin_w, Cout = w_io.shape
    assert Cin == Cin_w, "weight in_features mismatch"

    out_dtype = x.dtype
    if mxu_dtype is not None:
        x = x.astype(mxu_dtype)
        w_io = w_io.astype(mxu_dtype)
    bias = jnp.asarray(bias).astype(jnp.float32)

    isz = x.dtype.itemsize                 # matmul-input itemsize (bf16=2 / f32=4)
    osz = jnp.dtype(out_dtype).itemsize

    # Minimal alignment padding only: M -> multiple of 8, K/N -> multiple of 128.
    B_pad = _round_up(B, _SUBLANE)
    Cout_pad = _round_up(Cout, _LANE)
    Cin_pad = _round_up(Cin, _LANE)

    tm = min(512, B_pad)
    tn = min(512, Cout_pad)

    # Weight-resident fast-path working set (everything double-buffered).
    resident_bytes = (
        2 * tm * Cin_pad * isz       # x tile
        + 2 * Cin_pad * tn * isz     # W tile
        + 2 * _SUBLANE * tn * 4      # bias row (sublane-padded)
        + 2 * tm * tn * osz          # output tile
    )
    use_resident = resident_bytes <= _VMEM_BUDGET
    if path == "resident":
        use_resident = True
    elif path == "tiled":
        use_resident = False

    kernel_kw = dict(negative_slope=float(negative_slope))

    if use_resident:
        # ------------------- weight-resident fast path ------------------- #
        x_p = x
        if (B_pad, Cin_pad) != (B, Cin):
            x_p = jnp.pad(x, ((0, B_pad - B), (0, Cin_pad - Cin)))
        w_p = w_io
        if (Cin_pad, Cout_pad) != (Cin, Cout):
            w_p = jnp.pad(w_io, ((0, Cin_pad - Cin), (0, Cout_pad - Cout)))
        b_p = bias
        if Cout_pad != Cout:
            b_p = jnp.pad(bias, (0, Cout_pad - Cout))
        b_p = b_p.reshape(1, Cout_pad)

        # N (Cout) is the outer axis: W/bias slices are fetched once total and
        # the second TensorCore on v7x gets work even when B is small.
        grid = (pl.cdiv(Cout_pad, tn), pl.cdiv(B_pad, tm))

        out = pl.pallas_call(
            functools.partial(_resident_kernel, **kernel_kw),
            out_shape=jax.ShapeDtypeStruct((B_pad, Cout_pad), out_dtype),
            grid_spec=pltpu.PrefetchScalarGridSpec(
                num_scalar_prefetch=0,
                grid=grid,
                in_specs=[
                    pl.BlockSpec((tm, Cin_pad), lambda j, i: (i, 0)),   # x tile
                    pl.BlockSpec((Cin_pad, tn), lambda j, i: (0, j)),   # W slab
                    pl.BlockSpec((1, tn), lambda j, i: (0, j)),         # bias row
                ],
                out_specs=pl.BlockSpec((tm, tn), lambda j, i: (i, j)),
            ),
            compiler_params=pltpu.CompilerParams(
                dimension_semantics=("parallel", "parallel"),
                vmem_limit_bytes=_vmem_limit(resident_bytes),
            ),
            cost_estimate=pl.CostEstimate(
                flops=2 * B_pad * Cin_pad * Cout_pad,
                bytes_accessed=(
                    B_pad * Cin_pad * isz
                    + Cin_pad * Cout_pad * isz
                    + B_pad * Cout_pad * osz
                    + Cout_pad * 4
                ),
                transcendentals=0,
            ),
            interpret=interpret,
        )(x_p, w_p, b_p)
        return out[:B, :Cout]

    # ---------------- general 3D-tiled path (large layers) ---------------- #
    tk = min(512, Cin_pad)
    Cin_padK = _round_up(Cin, tk)   # only K must be zero-padded to the tile

    tiled_bytes = (
        2 * tm * tk * isz
        + 2 * tk * tn * isz
        + 2 * _SUBLANE * tn * 4
        + 2 * tm * tn * osz
        + tm * tn * 4               # f32 accumulator scratch (single)
    )

    x_p = x
    if (B_pad, Cin_padK) != (B, Cin):
        x_p = jnp.pad(x, ((0, B_pad - B), (0, Cin_padK - Cin)))
    w_p = w_io
    if (Cin_padK, Cout_pad) != (Cin, Cout):
        w_p = jnp.pad(w_io, ((0, Cin_padK - Cin), (0, Cout_pad - Cout)))
    b_p = bias
    if Cout_pad != Cout:
        b_p = jnp.pad(bias, (0, Cout_pad - Cout))
    b_p = b_p.reshape(1, Cout_pad)

    grid = (pl.cdiv(B_pad, tm), pl.cdiv(Cout_pad, tn), Cin_padK // tk)

    # TODO(synk): when out_dtype is f32 the accumulator could live in o_ref
    # directly (saves tm*tn*4 bytes of VMEM); minor win, left out for simplicity.
    out = pl.pallas_call(
        functools.partial(_tiled_kernel, **kernel_kw),
        out_shape=jax.ShapeDtypeStruct((B_pad, Cout_pad), out_dtype),
        grid_spec=pltpu.PrefetchScalarGridSpec(
            num_scalar_prefetch=0,
            grid=grid,
            in_specs=[
                pl.BlockSpec((tm, tk), lambda i, j, k: (i, k)),   # x tile
                pl.BlockSpec((tk, tn), lambda i, j, k: (k, j)),   # W tile (Cin, Cout)
                pl.BlockSpec((1, tn), lambda i, j, k: (0, j)),    # bias row
            ],
            out_specs=pl.BlockSpec((tm, tn), lambda i, j, k: (i, j)),
            scratch_shapes=[pltpu.VMEM((tm, tn), jnp.float32)],
        ),
        compiler_params=pltpu.CompilerParams(
            dimension_semantics=("parallel", "parallel", "arbitrary"),
            vmem_limit_bytes=_vmem_limit(tiled_bytes),
        ),
        cost_estimate=pl.CostEstimate(
            flops=2 * B_pad * Cin_padK * Cout_pad,
            bytes_accessed=(
                B_pad * Cin_padK * isz
                + Cin_padK * Cout_pad * isz
                + B_pad * Cout_pad * osz
                + Cout_pad * 4
            ),
            transcendentals=0,
        ),
        interpret=interpret,
    )(x_p, w_p, b_p)
    return out[:B, :Cout]


def reference(x, weight, bias, negative_slope):
    y = x @ weight.T + bias
    return jnp.where(y >= 0, y, negative_slope * y)


if __name__ == "__main__":
    key = jax.random.PRNGKey(0)
    k_x, k_w, k_b, k_x2, k_w2, k_b2 = jax.random.split(key, 6)
    negative_slope = 0.2

    # ---- shipped DiscriminatorBlock size: batch=8, in=32, out=64 ----
    batch, in_channel, out_channel = 8, 32, 64
    bound = 1.0 / (in_channel ** 0.5)
    weight = jax.random.uniform(
        k_w, (out_channel, in_channel), jnp.float32, -bound, bound
    )
    bias = jax.random.uniform(k_b, (out_channel,), jnp.float32, -bound, bound)
    x = jax.random.normal(k_x, (batch, in_channel), jnp.float32)
    ref = reference(x, weight, bias, negative_slope)

    # Exact f32 MXU path (weight-resident), tight tolerance.
    out_f32 = jax.block_until_ready(
        discriminator_block(x, weight, bias, negative_slope, mxu_dtype=None)
    )
    assert out_f32.shape == (batch, out_channel)
    assert jnp.allclose(out_f32, ref, atol=1e-5, rtol=1e-5)

    # Default bf16 MXU path, with weights stored persistently pre-transposed/bf16.
    w_io, b_prep = prepare_params(weight, bias)  # one-time conversion
    out_bf16 = jax.block_until_ready(
        discriminator_block(x, w_io, b_prep, negative_slope, weight_layout="io")
    )
    assert out_bf16.shape == (batch, out_channel)
    assert jnp.allclose(out_bf16, ref, atol=5e-2, rtol=5e-2)  # bf16-matmul tolerance

    # ---- larger shape exercising the multi-tile weight-resident grid ----
    B2, Cin2, Cout2 = 1024, 256, 1024
    bound2 = 1.0 / (Cin2 ** 0.5)
    w2 = jax.random.uniform(k_w2, (Cout2, Cin2), jnp.float32, -bound2, bound2)
    b2 = jax.random.uniform(k_b2, (Cout2,), jnp.float32, -bound2, bound2)
    x2 = jax.random.normal(k_x2, (B2, Cin2), jnp.float32)
    out2 = jax.block_until_ready(discriminator_block(x2, w2, b2, negative_slope))
    assert jnp.allclose(out2, reference(x2, w2, b2, negative_slope),
                        atol=5e-2, rtol=5e-2)

    # ---- force the 3D-tiled fallback (K-reduction grid, zero-padded K) ----
    B3, Cin3, Cout3 = 128, 640, 512
    bound3 = 1.0 / (Cin3 ** 0.5)
    w3 = jax.random.uniform(k_w, (Cout3, Cin3), jnp.float32, -bound3, bound3)
    b3 = jax.random.uniform(k_b, (Cout3,), jnp.float32, -bound3, bound3)
    x3 = jax.random.normal(k_x, (B3, Cin3), jnp.float32)
    out3 = jax.block_until_ready(
        discriminator_block(x3, w3, b3, negative_slope, mxu_dtype=None, path="tiled")
    )
    assert jnp.allclose(out3, reference(x3, w3, b3, negative_slope),
                        atol=5e-4, rtol=5e-4)

    print("KERNEL_OK")
</pallas_src>

<mosaic_0001>
module attributes {stable_mosaic.version = 11 : i64} {
  func.func @_resident_kernel(%arg0: i32, %arg1: i32, %arg2: memref<8x128xf32, #tpu.memory_space<vmem>>, %arg3: memref<128x128xf32, #tpu.memory_space<vmem>>, %arg4: memref<1x128xf32, #tpu.memory_space<vmem>>, %arg5: memref<8x128xf32, #tpu.memory_space<vmem>>) attributes {dimension_semantics = [#tpu.dimension_semantics<parallel>, #tpu.dimension_semantics<parallel>], iteration_bounds = array<i64: 1, 1>, scalar_prefetch = 0 : i64, scratch_operands = 0 : i64, tpu.core_type = #tpu.core_type<tc>, window_params = [{transform_indices = @transform_0, window_bounds = array<i64: 8, 128>}, {transform_indices = @transform_1, window_bounds = array<i64: 128, 128>}, {transform_indices = @transform_2, window_bounds = array<i64: 1, 128>}, {transform_indices = @transform_3, window_bounds = array<i64: 8, 128>}]} {
    %c0 = arith.constant 0 : index
    %c0_0 = arith.constant 0 : index
    %0 = vector.load %arg2[%c0, %c0_0] : memref<8x128xf32, #tpu.memory_space<vmem>>, vector<8x128xf32>
    %c0_1 = arith.constant 0 : index
    %c0_2 = arith.constant 0 : index
    %1 = vector.load %arg3[%c0_1, %c0_2] : memref<128x128xf32, #tpu.memory_space<vmem>>, vector<128x128xf32>
    %cst = arith.constant dense<0.000000e+00> : vector<8x128xf32>
    %2 = tpu.matmul %0, %1, %cst {dimension_numbers = #tpu.dot_dimension_numbers<[1], [0], [0], [1], [0, 0, 1, 1], [], []>} : vector<8x128xf32>, vector<128x128xf32>, vector<8x128xf32> -> vector<8x128xf32>
    %c0_3 = arith.constant 0 : index
    %c0_4 = arith.constant 0 : index
    %3 = vector.load %arg4[%c0_3, %c0_4] : memref<1x128xf32, #tpu.memory_space<vmem>>, vector<1x128xf32>
    %4 = vector.broadcast %3 : vector<1x128xf32> to vector<8x128xf32>
    %5 = arith.addf %2, %4 : vector<8x128xf32>
    %cst_5 = arith.constant 0.000000e+00 : f32
    %6 = vector.broadcast %cst_5 : f32 to vector<8x128xf32>
    %7 = arith.cmpf oge, %5, %6 : vector<8x128xf32>
    %cst_6 = arith.constant 2.000000e-01 : f32
    %8 = vector.broadcast %cst_6 : f32 to vector<8x128xf32>
    %9 = arith.mulf %8, %5 : vector<8x128xf32>
    %10 = arith.select %7, %5, %9 : vector<8x128xi1>, vector<8x128xf32>
    %c0_7 = arith.constant 0 : index
    %c0_8 = arith.constant 0 : index
    %11 = vector.load %arg5[%c0_7, %c0_8] : memref<8x128xf32, #tpu.memory_space<vmem>>, vector<8x128xf32>
    tpu.vector_store %arg5[%c0_7, %c0_8], %10 {strides = array<i32>} : memref<8x128xf32, #tpu.memory_space<vmem>>, vector<8x128xf32>,
    return
  }
  func.func @transform_0(%arg0: i32, %arg1: i32) -> (i32, i32) {
    %c0_i32 = arith.constant 0 : i32
    %c0_i32_0 = arith.constant 0 : i32
    return %arg1, %c0_i32 : i32, i32
  }
  func.func @transform_1(%arg0: i32, %arg1: i32) -> (i32, i32) {
    %c0_i32 = arith.constant 0 : i32
    %c0_i32_0 = arith.constant 0 : i32
    return %c0_i32, %arg0 : i32, i32
  }
  func.func @transform_2(%arg0: i32, %arg1: i32) -> (i32, i32) {
    %c0_i32 = arith.constant 0 : i32
    %c0_i32_0 = arith.constant 0 : i32
    return %c0_i32, %arg0 : i32, i32
  }
  func.func @transform_3(%arg0: i32, %arg1: i32) -> (i32, i32) {
    %c0_i32 = arith.constant 0 : i32
    return %arg1, %arg0 : i32, i32
  }
}

</mosaic_0001>

<bundles_post_ra>
// kernel: tpu_custom_call.1
= control target key start
LH: loop header
LB: loop body
LE: loop exit
PB: predicated region body
PF: predicated region fallthrough
CT: control target
= control target key end

     0   :  { %8 = vsyncpa [#allocation3], 0  ;;  %s229_s0 = inlined_call_operand.hbm [shape: f32[8,128], index: 0, kind: input, shape index: {}]   ;;  %s230_s1 = inlined_call_operand.hbm [shape: f32[128,128], index: 1, kind: input, shape index: {}]   ;;  %s231_s2 = inlined_call_operand.vmem [shape: f32[1,128], index: 2, kind: input, shape index: {}]   ;;  %s232_s3 = inlined_call_operand.hbm [shape: f32[8,128], index: 3, kind: output, shape index: {}]  }
   0x1   :  { %9 = vsyncpa [#allocation6], 0 }
   0x2   :  { %10 = vsyncpa [#allocation4], 0  ;;  %s16_s14 = sshll.u32 %s229_s0, 4  ;;  %s192_s15 = smov [#allocation2]   ;;  %s17_s14 = int_to_ptr.hbm [resolvable:$true] %s16_s14 }
   0x3   :  { %s18_s16 = sshll.u32 %s192_s15, 4  ;;  %s26_s19 = sshll.u32 %s230_s1, 4  ;;  %s19_s16 = int_to_ptr.vmem [resolvable:$true] %s18_s16  ;;  %s27_s19 = int_to_ptr.hbm [resolvable:$true] %s26_s19 }
   0x4   :  { %21 = dma.hbm_to_vmem [thread:$0]  %s17_s14, 128, %s19_s16, [#allocation3]  }
   0x5   :  { %s193_s20 = smov [#allocation5]   ;;  %s194_s22 = smov 128  }
   0x6   :  { %s28_s21 = sshll.u32 %s193_s20, 4  ;;  %s195_s23 = smov 8   ;;  %s29_s21 = int_to_ptr.vmem [resolvable:$true] %s28_s21 }
   0x7   :  { %34 = dma.hbm_to_vmem [thread:$0]  %s27_s19, 2048, %s29_s21, [#allocation6], %s194_s22, %s194_s22, %s195_s23  }
   0x8   :  { %186 = dma.done.wait [#allocation3], 128  }
   0x9   :  { %187 = vsyncadd [#allocation3], 4294967168 }
   0xa   :  { %188 = dma.done.wait [#allocation6], 2048  }
   0xb   :  { %189 = vsyncadd [#allocation6], 4294965248  ;;  %v61_v0 = vld [vmem:[#allocation5 + $0x78] sm:$0xff]  ;;  %v60_v1 = vld [vmem:[#allocation5 + $0x70] sm:$0xff]  ;;  %s196_s24 = smov [#allocation7]   ;;  %s97_s28 = sshll.u32 %s232_s3, 4  ;;  %s98_s28 = int_to_ptr.hbm [resolvable:$true] %s97_s28 }
   0xc   :  { %66 = vmatpush.msra.mxu0 %v61_v0  ;;  %v59_v2 = vld [vmem:[#allocation5 + $0x68] sm:$0xff]  ;;  %v58_v3 = vld [vmem:[#allocation5 + $0x60] sm:$0xff]  ;;  %v57_v4 = vld [vmem:[#allocation5 + $0x58] sm:$0xff]  ;;  %s95_s25 = sshll.u32 %s196_s24, 4  ;;  %s96_s25 = int_to_ptr.vmem [resolvable:$true] %s95_s25 }
   0xd   :  { %v56_v5 = vld [vmem:[#allocation5 + $0x50] sm:$0xff]  ;;  %v55_v6 = vld [vmem:[#allocation5 + $0x48] sm:$0xff]  ;;  %v54_v7 = vld [vmem:[#allocation5 + $0x40] sm:$0xff] }
   0xe   :  { %67 = vmatpush.msra.mxu0 %v60_v1  ;;  %v53_v8 = vld [vmem:[#allocation5 + $0x38] sm:$0xff]  ;;  %v52_v9 = vld [vmem:[#allocation5 + $0x30] sm:$0xff]  ;;  %v51_v10 = vld [vmem:[#allocation5 + $0x28] sm:$0xff] }
   0xf   :  { %v50_v11 = vld [vmem:[#allocation5 + $0x20] sm:$0xff]  ;;  %v49_v12 = vld [vmem:[#allocation5 + $0x18] sm:$0xff]  ;;  %v48_v13 = vld [vmem:[#allocation5 + $0x10] sm:$0xff] }
  0x10   :  { %68 = vmatpush.msra.mxu0 %v59_v2  ;;  %v47_v14 = vld [vmem:[#allocation5 + $0x8] sm:$0xff]  ;;  %v46_v15 = vld [vmem:[#allocation5] sm:$0xff]  ;;  %v45_v16 = vld [vmem:[#allocation2] sm:$0xff] }
  0x11   :  { %v113_v17 = vld [vmem:[%s231_s2] ss:$0 sm:$0xff] }
  0x12   :  { %69 = vmatpush.msra.mxu0 %v58_v3 }
  0x14   :  { %70 = vmatpush.msra.mxu0 %v57_v4 }
  0x16   :  { %71 = vmatpush.msra.mxu0 %v56_v5 }
  0x18   :  { %72 = vmatpush.msra.mxu0 %v55_v6 }
  0x1a   :  { %73 = vmatpush.msra.mxu0 %v54_v7 }
  0x1c   :  { %74 = vmatpush.msra.mxu0 %v53_v8 }
  0x1e   :  { %75 = vmatpush.msra.mxu0 %v52_v9 }
  0x20   :  { %76 = vmatpush.msra.mxu0 %v51_v10 }
  0x22   :  { %77 = vmatpush.msra.mxu0 %v50_v11 }
  0x24   :  { %78 = vmatpush.msra.mxu0 %v49_v12 }
  0x26   :  { %79 = vmatpush.msra.mxu0 %v48_v13 }
  0x28   :  { %80 = vmatpush.msra.mxu0 %v47_v14 }
  0x2a   :  { %81 = vmatpush.msra.mxu0 %v46_v15 }
  0x2b   :  { %82 = vmatmul.f32.vlgmr.msra.gmra.mxu0 %v45_v16 }
  0xa8   :  { %v83_v18 = vpop.f32.mrf.mxu0 }
  0xa9   :  { %v84_v19 = vadd.f32 %v113_v17, %v83_v18 }
  0xab   :  { %vm86_vm0 = vcmp.ge.f32.partialorder %v84_v19, 0.0  ;;  %v87_v20 = vmul.f32 0.2, %v84_v19 }
  0xad   :  { %v88_v21 = vsel %vm86_vm0, %v84_v19, %v87_v20 }
  0xae   :  { %89 = vst [vmem:[#allocation7] sm:$0xff] %v88_v21 }
  0xaf   :  { %100 = dma.vmem_to_hbm [thread:$0]  %s96_s25, 128, %s98_s28, [#allocation4]  }
  0xb0   :  { %190 = dma.done.wait [#allocation4], 128  }
  0xb1   :  { %191 = vsyncadd [#allocation4], 4294967168 }
  0xb2   :  { %105 = vsyncpa [#allocation3], 1 }
  0xb3   :  { %106 = vsyncpa [#allocation6], 1 }
  0xb4   :  { %107 = vsyncpa [#allocation4], 1 }

</bundles_post_ra>
